<compile_context>
chip_gen: v7x
topology: tpu7x:2x2x1
jax: 0.10.0
libtpu: 0.0.40
codegen_flags: <defaults>
</compile_context>

<pallas_src>
import jax
import jax.numpy as jnp
from jax.experimental import pallas as pl
from jax.experimental.pallas import tpu as pltpu


# ----------------------------- Pallas kernel -------------------------------

def _sigmoid_kernel(x_ref, o_ref):
    # Upcast to f32 inside the kernel (HBM traffic stays at native width;
    # v5e VPU/EUP lack bf16 so f32 compute is the safe common path).
    x = x_ref[...].astype(jnp.float32)
    # sigmoid(x) == 0.5 * (tanh(x/2) + 1): single EUP transcendental,
    # no divide on the VPU.
    y = 0.5 * (jnp.tanh(0.5 * x) + 1.0)
    o_ref[...] = y.astype(o_ref.dtype)


# ------------------------------ JAX wrapper --------------------------------

_MAX_BLOCK_BYTES = 4 * 1024 * 1024   # per-block buffer target (v6e ~86% of
                                     # HBM roofline; v7x-safe w/ pinned vmem)
_MIN_SPLIT_BYTES = 1 * 1024 * 1024   # above this, force >=2 balanced grid
                                     # steps so v7x can megacore-shard

# Packed sublane multiple per itemsize: f32 -> 8, bf16/f16 -> 16, int8/fp8 -> 32.
_SUBLANE_MULT = {4: 8, 2: 16, 1: 32}


def _pick_lanes(n: int):
    """Widest lane count from {4096..128} that divides n, else None."""
    for lanes in (4096, 2048, 1024, 512, 256, 128):
        if n % lanes == 0:
            return lanes
    return None


def _round_up(x: int, m: int) -> int:
    return (x + m - 1) // m * m


def _largest_divisor(rows: int, target: int, mult: int):
    """Largest d | rows with d % mult == 0 and d <= target, else None."""
    best = None
    i = 1
    while i * i <= rows:
        if rows % i == 0:
            for d in (i, rows // i):
                if d <= target and d % mult == 0 and (best is None or d > best):
                    best = d
        i += 1
    return best


def _elementwise_pallas(x2d: jax.Array, kernel) -> jax.Array:
    """Run an elementwise kernel over a (rows, lanes) array.

    `lanes` must be a multiple of 128 OR the full (only) lane extent.
    """
    rows, lanes = x2d.shape
    itemsize = jnp.dtype(x2d.dtype).itemsize
    sub = _SUBLANE_MULT.get(itemsize, 8)
    total_bytes = rows * lanes * itemsize

    # Largest row-tile (multiple of the packed sublane count) whose block
    # stays under ~_MAX_BLOCK_BYTES.
    cap = max(sub, (_MAX_BLOCK_BYTES // (lanes * itemsize)) // sub * sub)

    if total_bytes > _MIN_SPLIT_BYTES:
        # At least 2 roughly balanced steps -> v7x megacore can shard the
        # 'parallel' axis; harmless on v5e/v6e.
        target = min(cap, max(sub, _round_up(pl.cdiv(rows, 2), sub)))
    else:
        target = cap

    if rows <= target:
        tile_rows = rows                       # single full-extent block
    else:
        # Prefer a divisor of rows so every store is a full, unmasked vst
        # (v5e has only one vector-store slot).
        tile_rows = _largest_divisor(rows, target, sub)
        if tile_rows is None:
            tile_rows = target                 # ragged last block (masked)

    grid = (pl.cdiv(rows, tile_rows),)

    # Pin the VMEM budget to the real double-buffered in+out block footprint
    # plus headroom, so block choices tuned for v6e never blow v7x's limit.
    block_bytes = tile_rows * lanes * itemsize
    vmem_limit = int(4 * block_bytes + (8 << 20))

    return pl.pallas_call(
        kernel,
        out_shape=jax.ShapeDtypeStruct((rows, lanes), x2d.dtype),
        grid_spec=pltpu.PrefetchScalarGridSpec(
            num_scalar_prefetch=0,
            grid=grid,
            in_specs=[pl.BlockSpec((tile_rows, lanes), lambda i: (i, 0))],
            out_specs=pl.BlockSpec((tile_rows, lanes), lambda i: (i, 0)),
        ),
        compiler_params=pltpu.CompilerParams(
            dimension_semantics=("parallel",),
            vmem_limit_bytes=vmem_limit,
        ),
    )(x2d)


class ModelPallas:
    """JAX/Pallas port of brain_connectivity.models.model.Model."""

    def __init__(self, binary_cls: bool):
        self.binary_cls = binary_cls
        # Base class has no learnable parameters (nothing to initialize).

    def forward(self, x):
        # TODO(synk): base-class forward raises NotImplementedError in PyTorch;
        # subclasses define the actual forward. Nothing to lower here.
        raise NotImplementedError

    def output_activation(self, x: jax.Array) -> jax.Array:
        if not self.binary_cls:
            # Identity: returning x is exactly the module semantics; a Pallas
            # copy kernel would only add a full HBM round trip.
            return x

        orig_shape = x.shape
        n = x.size
        lanes = _pick_lanes(n)

        if lanes is not None:
            # Pure reshape (layout-only) to a wide, lane-dense slab.
            x2d = x.reshape(-1, lanes)
            y2d = _elementwise_pallas(x2d, _sigmoid_kernel)
            return y2d.reshape(orig_shape)

        # Element count not a multiple of 128 (rare).
        itemsize = jnp.dtype(x.dtype).itemsize
        if n * itemsize <= _MAX_BLOCK_BYTES:
            # Single full-extent (1, n) block: both dims equal the array
            # extents, so the (8,128) divisibility rule does not apply and
            # there is no pad/slice HBM traffic.
            y = _elementwise_pallas(x.reshape(1, n), _sigmoid_kernel)
            return y.reshape(orig_shape)

        # TODO(synk): huge non-multiple-of-128 tensors fall back to XLA's
        # fused sigmoid; padding + slicing around a Pallas kernel would cost
        # ~3x the HBM traffic of the kernel itself.
        return jax.nn.sigmoid(x)


# --------------------------------- main ------------------------------------

if __name__ == "__main__":
    key = jax.random.PRNGKey(0)
    # Small NCHW-shaped logits tensor (batch=2, channels=4, spatial=16x16).
    x = jax.random.normal(key, (2, 4, 16, 16), dtype=jnp.float32)

    # binary_cls=True path (sigmoid in the kernel, lane-dense slab).
    model_bin = ModelPallas(binary_cls=True)
    y_bin = jax.block_until_ready(model_bin.output_activation(x))
    ref_bin = jax.nn.sigmoid(x)
    assert jnp.allclose(y_bin, ref_bin, atol=1e-5, rtol=1e-5), "sigmoid mismatch"

    # binary_cls=False path (identity; no kernel launch).
    model_id = ModelPallas(binary_cls=False)
    y_id = jax.block_until_ready(model_id.output_activation(x))
    assert jnp.allclose(y_id, x), "identity mismatch"

    # Ragged/odd-size bf16 input exercises the native-dtype full-extent path.
    key2 = jax.random.PRNGKey(1)
    xb = jax.random.normal(key2, (2, 3, 5, 7), dtype=jnp.bfloat16)
    yb = jax.block_until_ready(model_bin.output_activation(xb))
    ref_b = jax.nn.sigmoid(xb.astype(jnp.float32)).astype(jnp.bfloat16)
    assert yb.dtype == jnp.bfloat16
    assert jnp.allclose(yb.astype(jnp.float32), ref_b.astype(jnp.float32),
                        atol=2e-2), "bf16 sigmoid mismatch"

    # Mid-size tensor (2 MiB) exercises the multi-block / divisor tiling path
    # (>= 2 balanced grid steps for v7x megacore sharding).
    key3 = jax.random.PRNGKey(2)
    xm = jax.random.normal(key3, (16, 128, 256), dtype=jnp.float32)
    ym = jax.block_until_ready(model_bin.output_activation(xm))
    ref_m = jax.nn.sigmoid(xm)
    assert jnp.allclose(ym, ref_m, atol=1e-5, rtol=1e-5), "mid-size mismatch"

    print("KERNEL_OK")
</pallas_src>

<mosaic_0001>
module attributes {stable_mosaic.version = 11 : i64} {
  func.func @_sigmoid_kernel(%arg0: i32, %arg1: memref<1x2048xf32, #tpu.memory_space<vmem>>, %arg2: memref<1x2048xf32, #tpu.memory_space<vmem>>) attributes {dimension_semantics = [#tpu.dimension_semantics<parallel>], iteration_bounds = array<i64: 1>, scalar_prefetch = 0 : i64, scratch_operands = 0 : i64, tpu.core_type = #tpu.core_type<tc>, window_params = [{transform_indices = @transform_0, window_bounds = array<i64: 1, 2048>}, {transform_indices = @transform_1, window_bounds = array<i64: 1, 2048>}]} {
    %c0 = arith.constant 0 : index
    %c0_0 = arith.constant 0 : index
    %0 = vector.load %arg1[%c0, %c0_0] : memref<1x2048xf32, #tpu.memory_space<vmem>>, vector<1x2048xf32>
    %cst = arith.constant 5.000000e-01 : f32
    %1 = vector.broadcast %cst : f32 to vector<1x2048xf32>
    %2 = arith.mulf %1, %0 : vector<1x2048xf32>
    %3 = math.tanh %2 : vector<1x2048xf32>
    %cst_1 = arith.constant 1.000000e+00 : f32
    %4 = vector.broadcast %cst_1 : f32 to vector<1x2048xf32>
    %5 = arith.addf %3, %4 : vector<1x2048xf32>
    %cst_2 = arith.constant 5.000000e-01 : f32
    %6 = vector.broadcast %cst_2 : f32 to vector<1x2048xf32>
    %7 = arith.mulf %6, %5 : vector<1x2048xf32>
    %c0_3 = arith.constant 0 : index
    %c0_4 = arith.constant 0 : index
    %8 = vector.load %arg2[%c0_3, %c0_4] : memref<1x2048xf32, #tpu.memory_space<vmem>>, vector<1x2048xf32>
    tpu.vector_store %arg2[%c0_3, %c0_4], %7 {strides = array<i32>} : memref<1x2048xf32, #tpu.memory_space<vmem>>, vector<1x2048xf32>,
    return
  }
  func.func @transform_0(%arg0: i32) -> (i32, i32) {
    %c0_i32 = arith.constant 0 : i32
    %c0_i32_0 = arith.constant 0 : i32
    return %arg0, %c0_i32 : i32, i32
  }
  func.func @transform_1(%arg0: i32) -> (i32, i32) {
    %c0_i32 = arith.constant 0 : i32
    %c0_i32_0 = arith.constant 0 : i32
    return %arg0, %c0_i32 : i32, i32
  }
}

</mosaic_0001>

<bundles_post_ra>
// kernel: tpu_custom_call.1
= control target key start
LH: loop header
LB: loop body
LE: loop exit
PB: predicated region body
PF: predicated region fallthrough
CT: control target
= control target key end

     0   :  { %6 = vsyncpa [#allocation3], 0  ;;  %s138_s0 = inlined_call_operand.hbm [shape: f32[1,2048], index: 0, kind: input, shape index: {}]   ;;  %s139_s1 = inlined_call_operand.hbm [shape: f32[1,2048], index: 1, kind: output, shape index: {}]  }
   0x1   :  { %7 = vsyncpa [#allocation4], 0  ;;  %s102_s6 = smov [#allocation2]   ;;  %s54_s10 = scalar_lea.hbm %s138_s0, 256 }
   0x2   :  { %s14_s7 = sshll.u32 %s102_s6, 4  ;;  %p55_p0 = scmp.ne.s32.totalorder %s138_s0, %s54_s10  ;;  %s15_s7 = int_to_ptr.vmem [resolvable:$true] %s14_s7 }
   0x3   :  { %p58_p1 = scmp.lt.u32.totalorder %s54_s10, %s138_s0 }
   0x5   :  { %p60_p2 = pnand %p58_p1, %p55_p0 }
   0x7   :  { %63 = shalt.err (!%p60_p2)
}
   0x8   :  { %s64_s15 = scalar_lea.vmem %s15_s7, 256  ;;  %p69_p4 = scmp.lt.s32.totalorder %s15_s7, %s15_s7 }
   0x9   :  { %p65_p3 = scmp.ne.s32.totalorder %s15_s7, %s64_s15  ;;  %p70_p5 = scmp.lt.s32.totalorder %s64_s15, %s64_s15 }
   0xb   :  { %p71_p6 = por %p70_p5, %p69_p4 }
   0xd   :  { %p72_p7 = pnand %p71_p6, %p65_p3 }
   0xf   :  { %75 = shalt.err (!%p72_p7)
}
  0x10   :  { %17 = dma.hbm_to_vmem [thread:$0]  %s138_s0, 256, %s15_s7, [#allocation3]  }
  0x11   :  { %98 = dma.done.wait [#allocation3], 256  }
  0x12   :  { %99 = vsyncadd [#allocation3], 4294967040  ;;  %v21_v0 = vld [vmem:[#allocation2] sm:$0xff]  ;;  %v22_v1 = vld [vmem:[#allocation2 + $0x8] sm:$0xff]  ;;  %s103_s18 = smov [#allocation5]  }
  0x13   :  { %v23_v2 = vmul.f32 0.5, %v21_v0  ;;  %v24_v3 = vmul.f32 0.5, %v22_v1  ;;  %s39_s19 = sshll.u32 %s103_s18, 4  ;;  %s40_s19 = int_to_ptr.vmem [resolvable:$true] %s39_s19 }
  0x14   :  { %s76_s0 = scalar_lea.vmem %s40_s19, 256  ;;  %p81_p9 = scmp.lt.s32.totalorder %s40_s19, %s40_s19 }
  0x15   :  { %50 = vtanh.f32 %v23_v2  ;;  %p77_p8 = scmp.ne.s32.totalorder %s40_s19, %s76_s0  ;;  %p82_p10 = scmp.lt.s32.totalorder %s76_s0, %s76_s0 }
  0x16   :  { %52 = vtanh.f32 %v24_v3 }
  0x17   :  { %p83_p11 = por %p82_p10, %p81_p9 }
  0x19   :  { %p84_p12 = pnand %p83_p11, %p77_p8 }
  0x1f   :  { %v51_v4 = vpop.eup %50 }
  0x20   :  { %v53_v5 = vpop.eup %52  ;;  %v27_v6 = vadd.f32 1.0, %v51_v4 }
  0x21   :  { %v28_v7 = vadd.f32 1.0, %v53_v5 }
  0x22   :  { %v29_v8 = vmul.f32 0.5, %v27_v6 }
  0x23   :  { %v30_v9 = vmul.f32 0.5, %v28_v7 }
  0x24   :  { %31 = vst [vmem:[#allocation5] sm:$0xff] %v29_v8 }
  0x25   :  { %32 = vst [vmem:[#allocation5 + $0x8] sm:$0xff] %v30_v9 }
  0x26   :  { %87 = shalt.err (!%p84_p12)
}
  0x27   :  { %s88_s22 = scalar_lea.hbm %s139_s1, 256 }
  0x28   :  { %p89_p13 = scmp.ne.s32.totalorder %s139_s1, %s88_s22  ;;  %p92_p0 = scmp.lt.u32.totalorder %s88_s22, %s139_s1 }
  0x2a   :  { %p94_p1 = pnand %p92_p0, %p89_p13 }
  0x2c   :  { %97 = shalt.err (!%p94_p1)
}
  0x2d   :  { %42 = dma.vmem_to_hbm [thread:$0]  %s40_s19, 256, %s139_s1, [#allocation4]  }
  0x2e   :  { %100 = dma.done.wait [#allocation4], 256  }
  0x2f   :  { %101 = vsyncadd [#allocation4], 4294967040 }
  0x30   :  { %46 = vsyncpa [#allocation3], 1 }
  0x31   :  { %47 = vsyncpa [#allocation4], 1 }

</bundles_post_ra>
